<compile_context>
chip_gen: v7x
topology: tpu7x:2x2x1
jax: 0.10.0
libtpu: 0.0.40
codegen_flags: <defaults>
</compile_context>

<pallas_src>
import functools
import math

import jax
import jax.numpy as jnp
from jax import lax
from jax.experimental import pallas as pl
from jax.experimental.pallas import tpu as pltpu

LANE = 128


# ----------------------------------------------------------------------------
# Fused kernel: RGCN block layer + pred-node select + score + log_softmax
# (one graph per grid step)
# ----------------------------------------------------------------------------
def _wordpredict_kernel(h0_ref, acat_ref, norm_ref, sel_ref, wcat_ref, temb_ref,
                        emb_ref, score_ref, tcat_ref, *,
                        num_rels, num_nodes, h_dim, num_preds):
    N, H, R = num_nodes, h_dim, num_rels

    # ---------------- RGCN block layer -------------------------------------------
    h0 = h0_ref[0]                                        # (N, H) bf16, loaded ONCE
    # All R relation transforms in a single MXU push: (N, H) @ (H, R*H).
    trans_all = jnp.dot(h0, wcat_ref[...], preferred_element_type=jnp.float32)
    # Relation-major restack directly into a bf16 scratch (static, sublane-aligned
    # slabs; N = 16 matches the bf16 (16,128) tile).
    for r in range(R):
        tcat_ref[r * N:(r + 1) * N, :] = (
            trans_all[:, r * H:(r + 1) * H].astype(jnp.bfloat16))
    # One aggregation matmul over K = R*N, per-node edge norm folded in.
    # TODO(synk): for larger graphs on v6e/v7x, pad/tile K to multiples of 256 and
    # replace the dense (N, R*N) adjacency with an edge-list + segment-sum formulation.
    emb = jnp.dot(acat_ref[0], tcat_ref[...],
                  preferred_element_type=jnp.float32) * norm_ref[0]
    emb_ref[0] = emb

    # ---------------- get_norm_score (fused) -------------------------------------
    emb_bf = emb.astype(jnp.bfloat16)
    # Pred-node gather as a tiny one-hot matmul: no dynamic scalar-addressed loads
    # through the freshly written output ref, no XLU/VPU repack chain.
    pred = jnp.dot(sel_ref[0], emb_bf, preferred_element_type=jnp.float32)  # (P_pad, H)
    # Pre-transposed target embedding -> canonical MXU layout, lane-dense output.
    s = jnp.dot(pred.astype(jnp.bfloat16), temb_ref[...],
                preferred_element_type=jnp.float32)                         # (P_pad, Vp)
    # Mask padded vocab columns, max-stabilized log_softmax in f32.
    col = lax.broadcasted_iota(jnp.int32, s.shape, 1)
    s = jnp.where(col < num_preds, s, -1e30)
    m = jnp.max(s, axis=1, keepdims=True)
    z = s - m
    lse = jnp.log(jnp.sum(jnp.exp(z), axis=1, keepdims=True))
    score_ref[0] = z - lse


def _fused_forward(h0, a_cat, norm, sel, w_cat, temb_T, *, num_preds):
    B, N, H = h0.shape
    RN = a_cat.shape[2]
    R = RN // N
    P_pad = sel.shape[1]
    Vp = temb_T.shape[1]
    kernel = functools.partial(_wordpredict_kernel, num_rels=R, num_nodes=N,
                               h_dim=H, num_preds=num_preds)
    flops = B * (2 * N * H * (R * H) + 2 * N * RN * H
                 + 2 * P_pad * N * H + 2 * P_pad * H * Vp)
    transcendentals = B * (P_pad * Vp + P_pad)
    bytes_accessed = (h0.size * 2 + a_cat.size * 2 + norm.size * 4 + sel.size * 2
                      + w_cat.size * 2 + temb_T.size * 2
                      + B * N * H * 4 + B * P_pad * Vp * 4)
    return pl.pallas_call(
        kernel,
        out_shape=(jax.ShapeDtypeStruct((B, N, H), jnp.float32),      # embedding
                   jax.ShapeDtypeStruct((B, P_pad, Vp), jnp.float32)),  # padded scores
        grid_spec=pltpu.PrefetchScalarGridSpec(
            num_scalar_prefetch=0,
            grid=(B,),
            in_specs=[
                pl.BlockSpec((1, N, H), lambda b: (b, 0, 0)),        # h0        bf16
                pl.BlockSpec((1, N, RN), lambda b: (b, 0, 0)),       # A_cat     bf16
                pl.BlockSpec((1, N, 1), lambda b: (b, 0, 0)),        # norm      f32
                pl.BlockSpec((1, P_pad, N), lambda b: (b, 0, 0)),    # one-hot   bf16
                pl.BlockSpec((H, R * H), lambda b: (0, 0)),          # W_cat (shared)
                pl.BlockSpec((H, Vp), lambda b: (0, 0)),             # temb_T (shared)
            ],
            out_specs=(pl.BlockSpec((1, N, H), lambda b: (b, 0, 0)),
                       pl.BlockSpec((1, P_pad, Vp), lambda b: (b, 0, 0))),
            scratch_shapes=[pltpu.VMEM((R * N, H), jnp.bfloat16)],   # relation-major T
        ),
        compiler_params=pltpu.CompilerParams(
            dimension_semantics=("parallel",)),                      # v7x: 2 TCs share graphs
        cost_estimate=pl.CostEstimate(flops=flops,
                                      transcendentals=transcendentals,
                                      bytes_accessed=bytes_accessed),
    )(h0, a_cat, norm, sel, w_cat, temb_T)


# ----------------------------------------------------------------------------
# Parameter prep: run ONCE outside the jitted forward (these are parameters).
# ----------------------------------------------------------------------------
def prepare_params(w_blocks, target_emb):
    R, Bk, si, so = w_blocks.shape
    H_in, H_out = Bk * si, Bk * so
    w_dense = jnp.zeros((R, H_in, H_out), jnp.float32)
    for b in range(Bk):
        w_dense = w_dense.at[:, b * si:(b + 1) * si, b * so:(b + 1) * so].set(w_blocks[:, b])
    # Output-stacked W_cat (H, R*H): columns r*H:(r+1)*H hold W_r (single MXU transform).
    w_cat = jnp.concatenate([w_dense[r] for r in range(R)], axis=1)
    V, H = target_emb.shape
    Vp = ((V + LANE - 1) // LANE) * LANE                   # lane-dense score output
    temb_T = jnp.zeros((H, Vp), jnp.float32).at[:, :V].set(target_emb.T)
    return w_cat.astype(jnp.bfloat16), temb_T.astype(jnp.bfloat16)


# ----------------------------------------------------------------------------
# WordPredict forward wrapper (embedding lookup + adjacency / selector layout = XLA glue)
# ----------------------------------------------------------------------------
@functools.partial(jax.jit, static_argnames=("num_preds",))
def word_predict(node_ids, adj, norm, emb_table, w_cat, temb_T,
                 pred_graph_nodes, *, num_preds):
    B, R, N, _ = adj.shape
    P = pred_graph_nodes.shape[1]
    # EmbeddingLayer: h0 = embedding(node_id), per graph.
    h0 = jnp.take(emb_table, node_ids, axis=0).astype(jnp.bfloat16)          # (B, N, H)
    # A_cat[g, v, r*N + u] = #edges u->v with relation r (relation-major columns,
    # matching the relation-major rows of the scratch inside the kernel).
    a_cat = jnp.transpose(adj, (0, 2, 1, 3)).reshape(B, N, R * N).astype(jnp.bfloat16)
    # One-hot pred-node selector: turns the in-kernel gather into one tiny MXU matmul.
    P_pad = max(8, ((P + 7) // 8) * 8)
    sel = jax.nn.one_hot(pred_graph_nodes, N, dtype=jnp.bfloat16)            # (B, P, N)
    if P_pad > P:
        sel = jnp.pad(sel, ((0, 0), (0, P_pad - P), (0, 0)))
    # TODO(synk): for realistic graph sizes, replace the dense (N, R*N) adjacency with an
    # edge-list / segment-sum formulation (PrefetchScalarGridSpec) and tile N / K for the
    # target generation's VMEM (64 MiB on v7x vs 128 MiB on v5e/v6e).
    emb, score_pad = _fused_forward(h0, a_cat, norm, sel, w_cat, temb_T,
                                    num_preds=num_preds)
    return emb, score_pad[:, :P, :num_preds]


# ----------------------------------------------------------------------------
# Pure-JAX reference mirroring the PyTorch/DGL block math (same bf16-operand /
# f32-accumulate matmul precision as the kernel) for a silent sanity check.
# ----------------------------------------------------------------------------
def reference(node_ids, adj, norm, emb_table, w_blocks, target_emb, pred_graph_nodes):
    R, Bk, si, so = w_blocks.shape
    h0 = emb_table[node_ids].astype(jnp.bfloat16)                    # (B, N, H)
    Bg, N, H = h0.shape
    h0_blk = h0.reshape(Bg, N, Bk, si)
    trans = jnp.einsum('gnbi,rbio->grnbo', h0_blk, w_blocks.astype(jnp.bfloat16),
                       preferred_element_type=jnp.float32)
    trans = trans.reshape(Bg, R, N, Bk * so)                         # (B, R, N, H)
    agg = jnp.einsum('grvu,gruh->gvh', adj.astype(jnp.bfloat16),
                     trans.astype(jnp.bfloat16),
                     preferred_element_type=jnp.float32)
    emb = agg * norm
    pred = jnp.take_along_axis(emb, pred_graph_nodes[..., None], axis=1)  # (B, P, H)
    score = jnp.einsum('gph,vh->gpv', pred.astype(jnp.bfloat16),
                       target_emb.astype(jnp.bfloat16),
                       preferred_element_type=jnp.float32)
    return emb, jax.nn.log_softmax(score, axis=-1)


if __name__ == "__main__":
    # Small shapes consistent with the module.
    NUM_VOCAB = 64      # num_nodes for nn.Embedding
    BATCH = 2           # graphs per fused call (grid axis, "parallel")
    N = 16              # graph nodes per graph
    H = 128             # h_dim (in_dim == h_dim)
    NUM_RELS = 4
    NUM_BASES = 4
    SUB = H // NUM_BASES
    NUM_PREDS = 32      # target_emb rows (prediction vocabulary)
    P = 8               # len(pred_graph_nodes) per graph
    NUM_EDGES = 48      # edges per graph

    key = jax.random.PRNGKey(0)
    k_emb, k_w, k_t, k_ids, k_src, k_dst, k_rel, k_pred = jax.random.split(key, 8)

    # nn.Embedding default init: N(0, 1)
    emb_table = jax.random.normal(k_emb, (NUM_VOCAB, H), dtype=jnp.float32)

    # RGCNBlockLayer.weight: xavier_uniform, gain = sqrt(2)
    gain = math.sqrt(2.0)
    fan_in_w, fan_out_w = NUM_BASES * SUB * SUB, NUM_RELS
    bw = gain * math.sqrt(6.0 / (fan_in_w + fan_out_w))
    w_blocks = jax.random.uniform(k_w, (NUM_RELS, NUM_BASES, SUB, SUB),
                                  minval=-bw, maxval=bw, dtype=jnp.float32)

    # target_emb: xavier_uniform, gain = sqrt(2)
    bt = gain * math.sqrt(6.0 / (H + NUM_PREDS))
    target_emb = jax.random.uniform(k_t, (NUM_PREDS, H),
                                    minval=-bt, maxval=bt, dtype=jnp.float32)

    # Synthetic graph batch: node ids, typed edges -> per-relation adjacency, node norms.
    node_ids = jax.random.randint(k_ids, (BATCH, N), 0, NUM_VOCAB, dtype=jnp.int32)
    src = jax.random.randint(k_src, (BATCH, NUM_EDGES), 0, N, dtype=jnp.int32)
    dst = jax.random.randint(k_dst, (BATCH, NUM_EDGES), 0, N, dtype=jnp.int32)
    rel = jax.random.randint(k_rel, (BATCH, NUM_EDGES), 0, NUM_RELS, dtype=jnp.int32)
    gidx = jnp.broadcast_to(jnp.arange(BATCH)[:, None], (BATCH, NUM_EDGES))
    adj = jnp.zeros((BATCH, NUM_RELS, N, N), dtype=jnp.float32).at[gidx, rel, dst, src].add(1.0)
    in_deg = adj.sum(axis=(1, 3))                                    # (B, N)
    norm = (1.0 / jnp.maximum(in_deg, 1.0))[..., None].astype(jnp.float32)  # (B, N, 1)

    pred_keys = jax.random.split(k_pred, BATCH)
    pred_graph_nodes = jnp.stack(
        [jax.random.permutation(k, N)[:P] for k in pred_keys]).astype(jnp.int32)  # (B, P)

    # One-time parameter prep (block-diagonal densification, output-stacking, transpose/pad).
    w_cat, temb_T = prepare_params(w_blocks, target_emb)

    emb, norm_score = word_predict(node_ids, adj, norm, emb_table, w_cat, temb_T,
                                   pred_graph_nodes, num_preds=NUM_PREDS)
    jax.block_until_ready((emb, norm_score))

    emb_ref, score_ref = reference(
        node_ids, adj, norm, emb_table, w_blocks, target_emb, pred_graph_nodes)
    # Tolerance accounts for bf16-operand rounding / accumulation-order differences
    # between the fused kernel and the block-einsum reference.
    assert jnp.allclose(emb, emb_ref, atol=1e-2, rtol=1e-2)
    assert jnp.allclose(norm_score, score_ref, atol=1e-2, rtol=1e-2)

    # TODO(synk): my_nll_loss (nll_loss + regularization) is a training loss, not the
    # forward pass; it is trivially computable from `norm_score`/`emb` in plain JAX.
    print("KERNEL_OK")
</pallas_src>

<mosaic_0001>
module attributes {stable_mosaic.version = 11 : i64} {
  func.func @_wordpredict_kernel(%arg0: i32, %arg1: memref<1x16x128xbf16, #tpu.memory_space<vmem>>, %arg2: memref<1x16x64xbf16, #tpu.memory_space<vmem>>, %arg3: memref<1x16x1xf32, #tpu.memory_space<vmem>>, %arg4: memref<1x8x16xbf16, #tpu.memory_space<vmem>>, %arg5: memref<128x512xbf16, #tpu.memory_space<vmem>>, %arg6: memref<128x128xbf16, #tpu.memory_space<vmem>>, %arg7: memref<1x16x128xf32, #tpu.memory_space<vmem>>, %arg8: memref<1x8x128xf32, #tpu.memory_space<vmem>>, %arg9: memref<64x128xbf16, #tpu.memory_space<vmem>>) attributes {dimension_semantics = [#tpu.dimension_semantics<parallel>], iteration_bounds = array<i64: 2>, scalar_prefetch = 0 : i64, scratch_operands = 1 : i64, tpu.core_type = #tpu.core_type<tc>, window_params = [{transform_indices = @transform_0, window_bounds = array<i64: 1, 16, 128>}, {transform_indices = @transform_1, window_bounds = array<i64: 1, 16, 64>}, {transform_indices = @transform_2, window_bounds = array<i64: 1, 16, 1>}, {transform_indices = @transform_3, window_bounds = array<i64: 1, 8, 16>}, {pipeline_mode = #tpu.pipeline_mode<synchronous>, transform_indices = @transform_4, window_bounds = array<i64: 128, 512>}, {pipeline_mode = #tpu.pipeline_mode<synchronous>, transform_indices = @transform_5, window_bounds = array<i64: 128, 128>}, {transform_indices = @transform_6, window_bounds = array<i64: 1, 16, 128>}, {transform_indices = @transform_7, window_bounds = array<i64: 1, 8, 128>}]} {
    %c0 = arith.constant 0 : index
    %c0_0 = arith.constant 0 : index
    %c0_1 = arith.constant 0 : index
    %0 = vector.load %arg1[%c0, %c0_0, %c0_1] : memref<1x16x128xbf16, #tpu.memory_space<vmem>>, vector<1x16x128xbf16>
    %1 = vector.shape_cast %0 : vector<1x16x128xbf16> to vector<16x128xbf16>
    %c0_2 = arith.constant 0 : index
    %c0_3 = arith.constant 0 : index
    %2 = vector.load %arg5[%c0_2, %c0_3] : memref<128x512xbf16, #tpu.memory_space<vmem>>, vector<128x512xbf16>
    %cst = arith.constant dense<0.000000e+00> : vector<16x512xf32>
    %3 = tpu.matmul %1, %2, %cst {dimension_numbers = #tpu.dot_dimension_numbers<[1], [0], [0], [1], [0, 0, 1, 1], [], []>} : vector<16x128xbf16>, vector<128x512xbf16>, vector<16x512xf32> -> vector<16x512xf32>
    %4 = vector.extract_strided_slice %3 {offsets = [0, 0], sizes = [16, 128], strides = [1, 1]} : vector<16x512xf32> to vector<16x128xf32>
    %5 = arith.truncf %4 : vector<16x128xf32> to vector<16x128xbf16>
    %c0_4 = arith.constant 0 : index
    %c0_5 = arith.constant 0 : index
    %6 = vector.load %arg9[%c0_4, %c0_5] : memref<64x128xbf16, #tpu.memory_space<vmem>>, vector<16x128xbf16>
    tpu.vector_store %arg9[%c0_4, %c0_5], %5 {strides = array<i32>} : memref<64x128xbf16, #tpu.memory_space<vmem>>, vector<16x128xbf16>,
    %7 = vector.extract_strided_slice %3 {offsets = [0, 128], sizes = [16, 128], strides = [1, 1]} : vector<16x512xf32> to vector<16x128xf32>
    %8 = arith.truncf %7 : vector<16x128xf32> to vector<16x128xbf16>
    %c16 = arith.constant 16 : index
    %c0_6 = arith.constant 0 : index
    %9 = vector.load %arg9[%c16, %c0_6] : memref<64x128xbf16, #tpu.memory_space<vmem>>, vector<16x128xbf16>
    tpu.vector_store %arg9[%c16, %c0_6], %8 {strides = array<i32>} : memref<64x128xbf16, #tpu.memory_space<vmem>>, vector<16x128xbf16>,
    %10 = vector.extract_strided_slice %3 {offsets = [0, 256], sizes = [16, 128], strides = [1, 1]} : vector<16x512xf32> to vector<16x128xf32>
    %11 = arith.truncf %10 : vector<16x128xf32> to vector<16x128xbf16>
    %c32 = arith.constant 32 : index
    %c0_7 = arith.constant 0 : index
    %12 = vector.load %arg9[%c32, %c0_7] : memref<64x128xbf16, #tpu.memory_space<vmem>>, vector<16x128xbf16>
    tpu.vector_store %arg9[%c32, %c0_7], %11 {strides = array<i32>} : memref<64x128xbf16, #tpu.memory_space<vmem>>, vector<16x128xbf16>,
    %13 = vector.extract_strided_slice %3 {offsets = [0, 384], sizes = [16, 128], strides = [1, 1]} : vector<16x512xf32> to vector<16x128xf32>
    %14 = arith.truncf %13 : vector<16x128xf32> to vector<16x128xbf16>
    %c48 = arith.constant 48 : index
    %c0_8 = arith.constant 0 : index
    %15 = vector.load %arg9[%c48, %c0_8] : memref<64x128xbf16, #tpu.memory_space<vmem>>, vector<16x128xbf16>
    tpu.vector_store %arg9[%c48, %c0_8], %14 {strides = array<i32>} : memref<64x128xbf16, #tpu.memory_space<vmem>>, vector<16x128xbf16>,
    %c0_9 = arith.constant 0 : index
    %c0_10 = arith.constant 0 : index
    %c0_11 = arith.constant 0 : index
    %16 = vector.load %arg2[%c0_9, %c0_10, %c0_11] : memref<1x16x64xbf16, #tpu.memory_space<vmem>>, vector<1x16x64xbf16>
    %17 = vector.shape_cast %16 : vector<1x16x64xbf16> to vector<16x64xbf16>
    %c0_12 = arith.constant 0 : index
    %c0_13 = arith.constant 0 : index
    %18 = vector.load %arg9[%c0_12, %c0_13] : memref<64x128xbf16, #tpu.memory_space<vmem>>, vector<64x128xbf16>
    %cst_14 = arith.constant dense<0.000000e+00> : vector<16x128xf32>
    %19 = tpu.matmul %17, %18, %cst_14 {dimension_numbers = #tpu.dot_dimension_numbers<[1], [0], [0], [1], [0, 0, 1, 1], [], []>} : vector<16x64xbf16>, vector<64x128xbf16>, vector<16x128xf32> -> vector<16x128xf32>
    %c0_15 = arith.constant 0 : index
    %c0_16 = arith.constant 0 : index
    %c0_17 = arith.constant 0 : index
    %20 = vector.load %arg3[%c0_15, %c0_16, %c0_17] : memref<1x16x1xf32, #tpu.memory_space<vmem>>, vector<1x16x1xf32>
    %21 = vector.shape_cast %20 : vector<1x16x1xf32> to vector<16x1xf32>
    %22 = vector.broadcast %21 : vector<16x1xf32> to vector<16x128xf32>
    %23 = arith.mulf %19, %22 : vector<16x128xf32>
    %c0_18 = arith.constant 0 : index
    %c0_19 = arith.constant 0 : index
    %c0_20 = arith.constant 0 : index
    %24 = vector.load %arg7[%c0_18, %c0_19, %c0_20] : memref<1x16x128xf32, #tpu.memory_space<vmem>>, vector<1x16x128xf32>
    %25 = vector.shape_cast %24 : vector<1x16x128xf32> to vector<16x128xf32>
    %26 = vector.shape_cast %23 : vector<16x128xf32> to vector<1x16x128xf32>
    tpu.vector_store %arg7[%c0_18, %c0_19, %c0_20], %26 {strides = array<i32>} : memref<1x16x128xf32, #tpu.memory_space<vmem>>, vector<1x16x128xf32>,
    %27 = arith.truncf %23 : vector<16x128xf32> to vector<16x128xbf16>
    %c0_21 = arith.constant 0 : index
    %c0_22 = arith.constant 0 : index
    %c0_23 = arith.constant 0 : index
    %28 = vector.load %arg4[%c0_21, %c0_22, %c0_23] : memref<1x8x16xbf16, #tpu.memory_space<vmem>>, vector<1x8x16xbf16>
    %29 = vector.shape_cast %28 : vector<1x8x16xbf16> to vector<8x16xbf16>
    %cst_24 = arith.constant dense<0.000000e+00> : vector<8x128xf32>
    %30 = tpu.matmul %29, %27, %cst_24 {dimension_numbers = #tpu.dot_dimension_numbers<[1], [0], [0], [1], [0, 0, 1, 1], [], []>} : vector<8x16xbf16>, vector<16x128xbf16>, vector<8x128xf32> -> vector<8x128xf32>
    %31 = arith.truncf %30 : vector<8x128xf32> to vector<8x128xbf16>
    %c0_25 = arith.constant 0 : index
    %c0_26 = arith.constant 0 : index
    %32 = vector.load %arg6[%c0_25, %c0_26] : memref<128x128xbf16, #tpu.memory_space<vmem>>, vector<128x128xbf16>
    %cst_27 = arith.constant dense<0.000000e+00> : vector<8x128xf32>
    %33 = tpu.matmul %31, %32, %cst_27 {dimension_numbers = #tpu.dot_dimension_numbers<[1], [0], [0], [1], [0, 0, 1, 1], [], []>} : vector<8x128xbf16>, vector<128x128xbf16>, vector<8x128xf32> -> vector<8x128xf32>
    %34 = tpu.iota {dimensions = array<i32: 1>} : vector<8x128xi32>
    %c32_i32 = arith.constant 32 : i32
    %35 = vector.broadcast %c32_i32 : i32 to vector<8x128xi32>
    %36 = arith.cmpi slt, %34, %35 : vector<8x128xi32>
    %cst_28 = arith.constant -1.000000e+30 : f32
    %37 = vector.broadcast %cst_28 : f32 to vector<8x128xf32>
    %38 = arith.select %36, %33, %37 : vector<8x128xi1>, vector<8x128xf32>
    %cst_29 = arith.constant dense<0xFF800000> : vector<8xf32>
    %39 = vector.multi_reduction <maximumf>, %38, %cst_29 [1] : vector<8x128xf32> to vector<8xf32>
    %40 = vector.shape_cast %39 : vector<8xf32> to vector<8x1xf32>
    %41 = vector.broadcast %40 : vector<8x1xf32> to vector<8x128xf32>
    %42 = arith.subf %38, %41 : vector<8x128xf32>
    %43 = math.exp %42 : vector<8x128xf32>
    %cst_30 = arith.constant dense<0.000000e+00> : vector<8xf32>
    %44 = vector.multi_reduction <add>, %43, %cst_30 [1] : vector<8x128xf32> to vector<8xf32>
    %45 = vector.shape_cast %44 : vector<8xf32> to vector<8x1xf32>
    %46 = math.log %45 : vector<8x1xf32>
    %47 = vector.broadcast %46 : vector<8x1xf32> to vector<8x128xf32>
    %48 = arith.subf %42, %47 : vector<8x128xf32>
    %c0_31 = arith.constant 0 : index
    %c0_32 = arith.constant 0 : index
    %c0_33 = arith.constant 0 : index
    %49 = vector.load %arg8[%c0_31, %c0_32, %c0_33] : memref<1x8x128xf32, #tpu.memory_space<vmem>>, vector<1x8x128xf32>
    %50 = vector.shape_cast %49 : vector<1x8x128xf32> to vector<8x128xf32>
    %51 = vector.shape_cast %48 : vector<8x128xf32> to vector<1x8x128xf32>
    tpu.vector_store %arg8[%c0_31, %c0_32, %c0_33], %51 {strides = array<i32>} : memref<1x8x128xf32, #tpu.memory_space<vmem>>, vector<1x8x128xf32>,
    return
  }
  func.func @transform_0(%arg0: i32) -> (i32, i32, i32) {
    %c0_i32 = arith.constant 0 : i32
    %c0_i32_0 = arith.constant 0 : i32
    %c0_i32_1 = arith.constant 0 : i32
    return %arg0, %c0_i32, %c0_i32_0 : i32, i32, i32
  }
  func.func @transform_1(%arg0: i32) -> (i32, i32, i32) {
    %c0_i32 = arith.constant 0 : i32
    %c0_i32_0 = arith.constant 0 : i32
    %c0_i32_1 = arith.constant 0 : i32
    return %arg0, %c0_i32, %c0_i32_0 : i32, i32, i32
  }
  func.func @transform_2(%arg0: i32) -> (i32, i32, i32) {
    %c0_i32 = arith.constant 0 : i32
    %c0_i32_0 = arith.constant 0 : i32
    %c0_i32_1 = arith.constant 0 : i32
    return %arg0, %c0_i32, %c0_i32_0 : i32, i32, i32
  }
  func.func @transform_3(%arg0: i32) -> (i32, i32, i32) {
    %c0_i32 = arith.constant 0 : i32
    %c0_i32_0 = arith.constant 0 : i32
    %c0_i32_1 = arith.constant 0 : i32
    return %arg0, %c0_i32, %c0_i32_0 : i32, i32, i32
  }
  func.func @transform_4(%arg0: i32) -> (i32, i32) {
    %c0_i32 = arith.constant 0 : i32
    %c0_i32_0 = arith.constant 0 : i32
    %c0_i32_1 = arith.constant 0 : i32
    return %c0_i32, %c0_i32_0 : i32, i32
  }
  func.func @transform_5(%arg0: i32) -> (i32, i32) {
    %c0_i32 = arith.constant 0 : i32
    %c0_i32_0 = arith.constant 0 : i32
    %c0_i32_1 = arith.constant 0 : i32
    return %c0_i32, %c0_i32_0 : i32, i32
  }
  func.func @transform_6(%arg0: i32) -> (i32, i32, i32) {
    %c0_i32 = arith.constant 0 : i32
    %c0_i32_0 = arith.constant 0 : i32
    %c0_i32_1 = arith.constant 0 : i32
    return %arg0, %c0_i32, %c0_i32_0 : i32, i32, i32
  }
  func.func @transform_7(%arg0: i32) -> (i32, i32, i32) {
    %c0_i32 = arith.constant 0 : i32
    %c0_i32_0 = arith.constant 0 : i32
    %c0_i32_1 = arith.constant 0 : i32
    return %arg0, %c0_i32, %c0_i32_0 : i32, i32, i32
  }
}

</mosaic_0001>

<bundles_post_ra>
// kernel: word_predict.1
= control target key start
LH: loop header
LB: loop body
LE: loop exit
PB: predicated region body
PF: predicated region fallthrough
CT: control target
= control target key end

     0   :  { %13 = vsyncpa [#allocation4], 0  ;;  %s1699_s0 = inlined_call_operand.vmem [shape: bf16[2,16,128], index: 0, kind: input, shape index: {}]   ;;  %s1700_s1 = inlined_call_operand.vmem [shape: bf16[2,16,64], index: 1, kind: input, shape index: {}]   ;;  %s1701_s2 = inlined_call_operand.vmem [shape: f32[2,16,1], index: 2, kind: input, shape index: {}]   ;;  %s1702_s3 = inlined_call_operand.vmem [shape: bf16[2,8,16], index: 3, kind: input, shape index: {}]   ;;  %s1703_s4 = inlined_call_operand.vmem [shape: bf16[128,512], index: 4, kind: input, shape index: {}]   ;;  %s1704_s5 = inlined_call_operand.vmem [shape: bf16[128,128], index: 5, kind: input, shape index: {}]   ;;  %s1705_s6 = inlined_call_operand.hbm [shape: f32[2,16,128], index: 6, kind: output, shape index: {0}]   ;;  %s1706_s7 = inlined_call_operand.hbm [shape: f32[2,8,128], index: 7, kind: output, shape index: {1}]  }
   0x1   :  { %15 = vsyncpa [#allocation4 + $0x1], 0 }
   0x2   :  { %16 = vsyncpa [#allocation6], 0 }
   0x3   :  { %18 = vsyncpa [#allocation6 + $0x1], 0  ;;  %s1417_s24 = smov 0   ;;  %s1419_s25 = smov 0  }
   0x4   :  { %s1421_s26 = smov 0   ;;  %s1423_s27 = smov 0  }
   0x5 LB: > { %s1438_s28 = sadd.s32 4294967295, %s1368_s27   ;;  %s1040_s29 = sadd.s32 4294967294, %s1368_s27   ;;  %s1368_s27 = sphi %s1423_s27, %s1712_s27   ;;  %s1364_s26 = sphi %s1421_s26, %s1711_s26   ;;  %s1360_s25 = sphi %s1419_s25, %s1710_s25   ;;  %s1356_s24 = sphi %s1417_s24, %s1709_s24  }
   0x6   : > { %s1442_s30 = sadd.s32 1, %s1368_s27   ;;  %s177_s8 = sadd.s32 1, %s1364_s26 }
   0x7   : > { %s174_s9 = ssub.s32 %s1368_s27, %s1442_s30  ;;  %p187_p0 = scmp.ne.s32.totalorder %s1364_s26, %s1360_s25 }
   0x8   : > { %p175_p1 = scmp.eq.s32.totalorder %s174_s9, 0  ;;  %p188_p2 = scmp.eq.s32.totalorder %s1438_s28, 1 }
   0x9   : > { %p193_p3 = scmp.ne.s32.totalorder %s1360_s25, %s1356_s24  ;;  %p194_p4 = scmp.eq.s32.totalorder %s1040_s29, 1 }
   0xa   : > { %s1453_s10 = scalar_select %p175_p1, %s1364_s26, %s177_s8  }
   0xb   : > { %p1455_p5 = por %p188_p2, %p187_p0  ;;  %p1459_p6 = por %p194_p4, %p193_p3 }
   0xc   : > { %p1043_p7 = scmp.ge.s32.totalorder %s1368_s27, 1  ;;  %p275_p8 = scmp.lt.s32.totalorder %s1368_s27, 3 }
   0xe   : > { %p276_p9 = pnand %p1043_p7, %p275_p8 }
   0xf   : > { %v1212_v0 = vld [vmem:[%s1703_s4 + $0x4] ss:$16 sps:$4 sm:$0xff] (!%p276_p9)   ;;  %v1214_v1 = vld [vmem:[%s1703_s4] ss:$16 sps:$4 sm:$0xff] (!%p276_p9)   ;;  %v1370_v2 = vmov (!%p276_p9), 0   ;;  %p326_p10 = scmp.lt.s32.totalorder (!%p276_p9), %s1438_s28, 1 }
  0x10   : > { %279 = sbr.rel (%p276_p9) target bundleno = 1256 (0x4e8), region = 44  ;;  %578 = vmatprep.mubr.bf16.mxu0 (!%p276_p9), %v1370_v2  ;;  %621 = vmatprep.mubr.bf16.mxu1 (!%p276_p9), %v1370_v2  ;;  %v1215_v3 = vld [vmem:[%s1703_s4 + $0x24] ss:$16 sps:$4 sm:$0xff] (!%p276_p9)   ;;  %v1217_v4 = vld [vmem:[%s1703_s4 + $0x20] ss:$16 sps:$4 sm:$0xff] (!%p276_p9)   ;;  %v1371_v34 = vmov (!%p276_p9), 0.0  }
  0x11   : > { %546 = vmatprep.subr.bf16.mxu0 (!%p276_p9), %v1212_v0  ;;  %1211 = vset.pattern.permute.xlu0 (!%p276_p9), %v1370_v2  ;;  %v1218_v5 = vld [vmem:[%s1703_s4 + $0xc] ss:$16 sps:$4 sm:$0xff] (!%p276_p9)   ;;  %v1220_v6 = vld [vmem:[%s1703_s4 + $0x8] ss:$16 sps:$4 sm:$0xff] (!%p276_p9)   ;;  %v1221_v7 = vld [vmem:[%s1703_s4 + $0x44] ss:$16 sps:$4 sm:$0xff] (!%p276_p9)  }
  0x12   : > { %547 = vmatpush1.bf16.msra.mxu0 (!%p276_p9), %v1214_v1  ;;  %589 = vmatprep.subr.bf16.mxu1 (!%p276_p9), %v1218_v5  ;;  %v1224_v8 = vld [vmem:[%s1703_s4 + $0x2c] ss:$16 sps:$4 sm:$0xff] (!%p276_p9)   ;;  %v1226_v9 = vld [vmem:[%s1703_s4 + $0x28] ss:$16 sps:$4 sm:$0xff] (!%p276_p9)   ;;  %v1223_v10 = vld [vmem:[%s1703_s4 + $0x40] ss:$16 sps:$4 sm:$0xff] (!%p276_p9)  }
  0x13   : > { %548 = vmatprep.subr.bf16.mxu0 (!%p276_p9), %v1215_v3  ;;  %590 = vmatpush1.bf16.msra.mxu1 (!%p276_p9), %v1220_v6  ;;  %v1227_v11 = vld [vmem:[%s1703_s4 + $0x64] ss:$16 sps:$4 sm:$0xff] (!%p276_p9)   ;;  %v1230_v12 = vld [vmem:[%s1703_s4 + $0x4c] ss:$16 sps:$4 sm:$0xff] (!%p276_p9)   ;;  %v1232_v13 = vld [vmem:[%s1703_s4 + $0x48] ss:$16 sps:$4 sm:$0xff] (!%p276_p9)  }
  0x14   : > { %591 = vmatprep.subr.bf16.mxu1 (!%p276_p9), %v1224_v8  ;;  %v1229_v14 = vld [vmem:[%s1703_s4 + $0x60] ss:$16 sps:$4 sm:$0xff] (!%p276_p9)   ;;  %v1236_v15 = vld [vmem:[%s1703_s4 + $0x6c] ss:$16 sps:$4 sm:$0xff] (!%p276_p9)   ;;  %v1233_v16 = vld [vmem:[%s1703_s4 + $0x84] ss:$16 sps:$4 sm:$0xff] (!%p276_p9)  }
  0x15   : > { %v1238_v17 = vld [vmem:[%s1703_s4 + $0x68] ss:$16 sps:$4 sm:$0xff] (!%p276_p9)   ;;  %v1235_v18 = vld [vmem:[%s1703_s4 + $0x80] ss:$16 sps:$4 sm:$0xff] (!%p276_p9)   ;;  %v1242_v19 = vld [vmem:[%s1703_s4 + $0x8c] ss:$16 sps:$4 sm:$0xff] (!%p276_p9)  }
  0x16   : > { %549 = vmatpush1.bf16.msra.mxu0 (!%p276_p9), %v1217_v4  ;;  %v1239_v20 = vld [vmem:[%s1703_s4 + $0xa4] ss:$16 sps:$4 sm:$0xff] (!%p276_p9)   ;;  %v1244_v21 = vld [vmem:[%s1703_s4 + $0x88] ss:$16 sps:$4 sm:$0xff] (!%p276_p9)   ;;  %v1241_v22 = vld [vmem:[%s1703_s4 + $0xa0] ss:$16 sps:$4 sm:$0xff] (!%p276_p9)  }
  0x17   : > { %550 = vmatprep.subr.bf16.mxu0 %v1221_v7  ;;  %592 = vmatpush1.bf16.msra.mxu1 %v1226_v9  ;;  %s1515_s17 = scalar_select %p326_p10, %s1438_s28, 1  ;;  %v1248_v23 = vld [vmem:[%s1703_s4 + $0xac] ss:$16 sps:$4 sm:$0xff]   ;;  %v1245_v24 = vld [vmem:[%s1703_s4 + $0xc4] ss:$16 sps:$4 sm:$0xff]   ;;  %vm1372_vm0 = vmmov 0   ;;  %v863_v9 = vlaneseq }
  0x18   : > { %593 = vmatprep.subr.bf16.mxu1 %v1230_v12  ;;  %v1247_v25 = vld [vmem:[%s1703_s4 + $0xc0] ss:$16 sps:$4 sm:$0xff]   ;;  %v1250_v26 = vld [vmem:[%s1703_s4 + $0xa8] ss:$16 sps:$4 sm:$0xff]   ;;  %v1251_v27 = vld [vmem:[%s1703_s4 + $0xe4] ss:$16 sps:$4 sm:$0xff]  }
  0x19   : > { %s1104_s9 = sshll.u32 %s1515_s17, 3  ;;  %v1254_v28 = vld [vmem:[%s1703_s4 + $0xcc] ss:$16 sps:$4 sm:$0xff]   ;;  %v1256_v29 = vld [vmem:[%s1703_s4 + $0xc8] ss:$16 sps:$4 sm:$0xff]   ;;  %s1106_s21 = sshll.u32 %s1515_s17, 4 }
  0x1a   : > { %551 = vmatpush1.bf16.msra.mxu0 %v1223_v10  ;;  %s330_s22 = scalar_lea.vmem %s1699_s0, %s1104_s9  ;;  %s1548_s14 = scalar_lea.vmem %s1700_s1, %s1104_s9  ;;  %v1253_v30 = vld [vmem:[%s1703_s4 + $0xe0] ss:$16 sps:$4 sm:$0xff]   ;;  %v1259_v31 = vld [vmem:[%s1703_s4 + $0xec] ss:$16 sps:$4 sm:$0xff]   ;;  %v1261_v33 = vld [vmem:[%s1703_s4 + $0xe8] ss:$16 sps:$4 sm:$0xff]  }
  0x1b   : > { %552 = vmatprep.subr.bf16.mxu0 %v1227_v11  ;;  %594 = vmatpush1.bf16.msra.mxu1 %v1232_v13  ;;  %v1257_v32 = vld [vmem:[%s330_s22] sm:$0xff]   ;;  %s340_s29 = scalar_lea.vmem %s1701_s2, %s1106_s21  ;;  %vm651_vm1 = vcmask 523264   ;;  %v1263_v51 = vld [vmem:[%s1704_s5 + $0x8] sm:$0xff]   ;;  %v1264_v52 = vld [vmem:[%s1704_s5 + $0x10] sm:$0xff]   ;;  %s1604_s8 = sand.u32 1, %s1360_s25   ;;  %vm714_vm2 = vcmask 130048  }
  0x1c   : > { %595 = vmatprep.subr.bf16.mxu1 %v1236_v15  ;;  %v696_v35 = vld [vmem:[%s340_s29] sm:$0xff]  ;;  %v697_v36 = vld [vmem:[%s340_s29 + $0x8] sm:$0xff]  ;;  %v1265_v53 = vld [vmem:[%s1704_s5 + $0x18] sm:$0xff]   ;;  %s1044_s13 = sshll.u32 %s1604_s8, 4  ;;  %s1052_s15 = sshll.u32 %s1515_s17, 2  ;;  %v864_v10 = vand.u32 127, %v863_v9 }
  0x1d   : > { %700 = vperm.xlu0 %1211, %v696_v35   ;;  %v1258_v49 = vld [vmem:[%s1548_s14] sm:$0xff]   ;;  %v1267_v55 = vld [vmem:[%s1704_s5 + $0x28] sm:$0xff]   ;;  %v1268_v56 = vld [vmem:[%s1704_s5 + $0x30] sm:$0xff]   ;;  %s1608_s16 = scalar_lea.vmem [#allocation3], %s1044_s13  ;;  %s344_s19 = scalar_lea.vmem %s1702_s3, %s1052_s15 }
  0x1e   : > { %553 = vmatpush1.bf16.msra.mxu0 %v1229_v14  ;;  %v1262_v50 = vld [vmem:[%s1704_s5] sm:$0xff]   ;;  %v1269_v3 = vld [vmem:[%s1704_s5 + $0x38] sm:$0xff]   ;;  %vm865_vm3 = vcmp.lt.s32.totalorder %v864_v10, 32  ;;  %s897_s21 = sshll.u32 %s1608_s16, 4  ;;  %s1107_s23 = sshll.u32 %s1438_s28, 8  ;;  %s1619_s21 = int_to_ptr.vmem [resolvable:$true] %s897_s21 }
  0x1f   : > { %554 = vmatprep.subr.bf16.mxu0 %v1233_v16  ;;  %596 = vmatpush1.bf16.msra.mxu1 %v1238_v17  ;;  %v1266_v54 = vld [vmem:[%s1704_s5 + $0x20] sm:$0xff]   ;;  %s1625_s9 = scalar_lea.hbm %s1705_s6, %s1107_s23  ;;  %s879_s13 = scalar_lea.sflag [#allocation4], %s1604_s8 }
  0x20   : > { %597 = vmatprep.subr.bf16.mxu1 %v1242_v19  ;;  %v713_v2 = vld [vmem:[%s344_s19] sm:$0xf]  ;;  %s1274_s15 = scalar_lea.vmem %s1619_s21, 256  ;;  %s1373_s18 = smov [#allocation3]  }
  0x21   : > { %705 = vperm.xlu0 %1211, %v697_v36   ;;  %p1275_p11 = scmp.ne.s32.totalorder %s1619_s21, %s1274_s15  ;;  %s1278_s14 = sshll.u32 %s1373_s18, 4  ;;  %s1279_s14 = int_to_ptr.vmem [resolvable:$false] %s1278_s14 }
  0x22   : > { %555 = vmatpush1.bf16.msra.mxu0 %v1235_v18  ;;  %p1281_p0 = scmp.lt.s32.totalorder %s1619_s21, %s1279_s14 }
  0x23   : > { %556 = vmatprep.subr.bf16.mxu0 %v1239_v20  ;;  %598 = vmatpush1.bf16.msra.mxu1 %v1244_v21  ;;  %p1276_p12 = pnand %p1275_p11, %p1455_p5 }
  0x24   : > { %599 = vmatprep.subr.bf16.mxu1 %v1248_v23 }
  0x25   : > { %p1277_p13 = pneg %p1276_p12 }
  0x26   : > { %557 = vmatpush1.bf16.msra.mxu0 %v1241_v22 }
  0x27   : > { %558 = vmatprep.subr.bf16.mxu0 %v1245_v24  ;;  %600 = vmatpush1.bf16.msra.mxu1 %v1250_v26 }
  0x28   : > { %601 = vmatprep.subr.bf16.mxu1 %v1254_v28 }
  0x2a   : > { %559 = vmatpush1.bf16.msra.mxu0 %v1247_v25 }
  0x2b   : > { %560 = vmatprep.subr.bf16.mxu0 %v1251_v27  ;;  %602 = vmatpush1.bf16.msra.mxu1 %v1256_v29 }
  0x2c   : > { %603 = vmatprep.subr.bf16.mxu1 %v1259_v31 }
  0x2e   : > { %561 = vmatpush1.bf16.msra.mxu0 %v1253_v30 }
  0x2f   : > { %604 = vmatpush1.bf16.msra.mxu1 %v1261_v33  ;;  %1124 = vmatprep.subr.bf16.mxu0 %v1371_v34 }
  0x30   : > { %1142 = vmatprep.subr.bf16.mxu1 %v1371_v34 }
  0x31   : > { %579 = vmatmul.mubr.bf16.vlgmr.msra.gmra.mrb[0].mxu0 %v1257_v32 }
  0x32   : > { %622 = vmatmul.mubr.bf16.vlgmr.msra.gmra.mrb[0].mxu1 %v1257_v32  ;;  %1132 = vmatprep.mubr.msk.bf16.mxu0 %vm1372_vm0, %v1371_v34 }
  0x33   : > { %1158 = vmatprep.mubr.msk.bf16.mxu1 %vm1372_vm0, %v1371_v34  ;;  %1143 = vmatpush3.bf16.msra.mxu1 %v1262_v50 }
  0x34   : > { %1144 = vmatprep.subr.bf16.mxu1 %v1371_v34 }
  0x37   : > { %1145 = vmatpush3.bf16.msra.mxu1 %v1263_v51 }
  0x38   : > { %1146 = vmatprep.subr.bf16.mxu1 %v1371_v34 }
  0x3b   : > { %1147 = vmatpush3.bf16.msra.mxu1 %v1264_v52 }
  0x3c   : > { %1148 = vmatprep.subr.bf16.mxu1 %v1371_v34 }
  0x3f   : > { %1149 = vmatpush3.bf16.msra.mxu1 %v1265_v53 }
  0x40   : > { %1150 = vmatprep.subr.bf16.mxu1 %v1371_v34 }
  0x43   : > { %1151 = vmatpush3.bf16.msra.mxu1 %v1266_v54 }
  0x44   : > { %1152 = vmatprep.subr.bf16.mxu1 %v1371_v34 }
  0x47   : > { %1153 = vmatpush3.bf16.msra.mxu1 %v1267_v55 }
  0x48   : > { %1154 = vmatprep.subr.bf16.mxu1 %v1371_v34 }
  0x4b   : > { %1155 = vmatpush3.bf16.msra.mxu1 %v1268_v56 }
  0x4c   : > { %1156 = vmatprep.subr.bf16.mxu1 %v1371_v34 }
  0x4f   : > { %1157 = vmatpush3.bf16.msra.mxu1 %v1269_v3 }
  0x9c   : > { %v701_v57 = vpop.permute.xlu0 %700 }
  0xa0   : > { %v706_v61 = vpop.permute.xlu0 %705 }
 0x104   : > { %v580_v37 = vpop.f32.mrb[0].mxu0 }
 0x105   : > { %v582_v38 = vpop.f32.mrb[1].mxu0  ;;  %v623_v42 = vpop.f32.mrb[0].mxu1 }
 0x106   : > { %v584_v39 = vpop.f32.mrb[2].mxu0  ;;  %v625_v44 = vpop.f32.mrb[1].mxu1 }
 0x107   : > { %v632_v40 = vpack.c.bf16 %v584_v39, %v580_v37  ;;  %v586_v41 = vpop.f32.mrb[3].mxu0  ;;  %v627_v45 = vpop.f32.mrb[2].mxu1 }
 0x108   : > { %v634_v43 = vpack.c.bf16 %v586_v41, %v582_v38  ;;  %v636_v46 = vpack.c.bf16 %v627_v45, %v623_v42  ;;  %v629_v47 = vpop.f32.mrb[3].mxu1 }
 0x109   : > { %1125 = vmatpush3.bf16.msra.mxu0 %v632_v40  ;;  %v638_v48 = vpack.c.bf16 %v629_v47, %v625_v44 }
 0x10a   : > { %1126 = vmatprep.subr.bf16.mxu0 %v1371_v34 }
 0x10d   : > { %1127 = vmatpush3.bf16.msra.mxu0 %v634_v43 }
 0x10e   : > { %1128 = vmatprep.subr.bf16.mxu0 %v1371_v34 }
 0x111   : > { %1129 = vmatpush3.bf16.msra.mxu0 %v636_v46 }
 0x112   : > { %1130 = vmatprep.subr.bf16.mxu0 %v1371_v34 }
 0x115   : > { %1131 = vmatpush3.bf16.msra.mxu0 %v638_v48 }
 0x116   : > { %1136 = vmatprep.subr.bf16.mxu0 %v1371_v34 }
 0x118   : > { %1133 = vmatmul.mubr.msk.bf16.vlgmr.msra.gmra.mrb[4].mxu0 %vm651_vm1, %v1258_v49 }
 0x119   : > { %1138 = vmatprep.mubr.msk.bf16.mxu0 %vm1372_vm0, %v1371_v34 }
 0x1eb   : > { %v689_v58 = vpop.f32.mrb[4].mxu0 }
 0x1ec   : > { %v708_v59 = vmul.f32 %v701_v57, %v689_v58  ;;  %v1134_v60 = vpop.f32.mrb[5].mxu0 }
 0x1ed   : > { %v692_v62 = vpop.f32.mrb[6].mxu0 }
 0x1ee   : > { %710 = vst [vmem:[%s1608_s16] sm:$0xff] %v708_v59  ;;  %v709_v63 = vmul.f32 %v706_v61, %v692_v62  ;;  %v1135_v0 = vpop.f32.mrb[7].mxu0 }
 0x1f0   : > { %711 = vst [vmem:[%s1608_s16 + $0x8] sm:$0xff] %v709_v63  ;;  %v712_v1 = vpack.c.bf16 %v709_v63, %v708_v59  ;;  %s1280_s16 = scalar_lea.vmem %s1279_s14, 512 }
 0x1f1   : > { %p1282_p1 = scmp.lt.s32.totalorder %s1280_s16, %s1274_s15 }
 0x1f2   : > { %1137 = vmatpush3.bf16.msra.mxu0 %v712_v1 }
 0x1f3   : > { %p1283_p2 = por %p1282_p1, %p1281_p0 }
 0x1f5   : > { %1139 = vmatmul.mubr.msk.bf16.vlgmr.msra.gmra.mrb[8].mxu0 %vm714_vm2, %v713_v2  ;;  %p1284_p3 = pnand %p1283_p2, %p1277_p13 }
 0x2c8   : > { %v752_v4 = vpop.f32.mrb[8].mxu0 }
 0x2c9   : > { %v758_v5 = vpack.c.bf16 %v752_v4, %v752_v4  ;;  %v1140_v6 = vpop.f32.mrb[9].mxu0 }
 0x2ca   : > { %v755_v7 = vpop.f32.mrb[10].mxu0 }
 0x2cb   : > { %1159 = vmatmul.mubr.bf16.vlgmr.msra.gmra.mrb[4].mxu1 %v758_v5  ;;  %v1141_v8 = vpop.f32.mrb[11].mxu0 }
 0x39e   : > { %v857_v11 = vpop.f32.mrb[4].mxu1 }
 0x39f   : > { %v866_v12 = vsel %vm865_vm3, %v857_v11, -1e+30  ;;  %v1160_v13 = vpop.f32.mrb[5].mxu1 }
 0x3a0   : > { %867 = vmax.xlane.f32.xlu1 %v866_v12  ;;  %v860_v14 = vpop.f32.mrb[6].mxu1 }
 0x3a1   : > { %v1161_v15 = vpop.f32.mrb[7].mxu1 }
 0x42d   : > { %v868_v16 = vpop.xlane.xlu1 %867 }
 0x42e   : > { %v869_v17 = vsub.f32 %v866_v12, %v868_v16 }
 0x430   : > { %v870_v18 = vmul.f32 1.442695, %v869_v17 }
 0x432   : > { %1270 = vpow2.f32 %v870_v18 }
 0x43c   : > { %v1271_v19 = vpop.eup %1270 }
 0x43d   : > { %872 = vadd.xlane.f32.xlu1 %v1271_v19 }
 0x43e   : > { %1287 = shalt.err (!%p1284_p3)
}
 0x43f   : > { %s1288_s19 = scalar_lea.hbm %s1625_s9, 256  ;;  %s1292_s23 = scalar_lea.hbm %s1705_s6, 512 }
 0x440   : > { %p1289_p4 = scmp.ne.s32.totalorder %s1625_s9, %s1288_s19  ;;  %p1293_p9 = scmp.lt.u32.totalorder %s1625_s9, %s1705_s6 }
 0x441   : > { %p1294_p10 = scmp.lt.u32.totalorder %s1292_s23, %s1288_s19  ;;  %p1296_p12 = scmp.lt.u32.totalorder %s1288_s19, %s1625_s9 }
 0x442   : > { %p1290_p7 = pnand %p1289_p4, %p1455_p5 }
 0x443   : > { %p1295_p11 = por %p1294_p10, %p1293_p9 }
 0x444   : > { %p1291_p8 = pneg %p1290_p7 }
 0x445   : > { %p1297_p13 = por %p1296_p12, %p1295_p11 }
 0x447   : > { %p1298_p0 = pnand %p1297_p13, %p1291_p8 }
 0x449   : > { %1301 = shalt.err (!%p1298_p0)
}
 0x44a   : > { %s1374_s15 = smov 128   ;;  %s1375_s18 = smov 8  }
 0x44b   : > { %1162 = dma.vmem_to_hbm [thread:$0]  (%p1455_p5), %s1619_s21, 256, %s1625_s9, %s879_s13, %s1374_s15, %s1374_s15, %s1375_s18  }
 0x44c   : > { %s1045_s14 = sshll.u32 %s1604_s8, 3  ;;  %s1101_s16 = sshll.u32 %s1438_s28, 7 }
 0x44d   : > { %s325_s19 = scalar_lea.vmem [#allocation5], %s1045_s14  ;;  %s1656_s22 = scalar_lea.hbm %s1706_s7, %s1101_s16 }
 0x44e   : > { %s913_s17 = sshll.u32 %s325_s19, 4  ;;  %s884_s21 = scalar_lea.sflag [#allocation6], %s1604_s8  ;;  %s1658_s17 = int_to_ptr.vmem [resolvable:$true] %s913_s17 }
 0x44f   : > { %s1302_s9 = scalar_lea.vmem %s1658_s17, 128  ;;  %s1376_s28 = smov [#allocation5]  }
 0x450   : > { %p1303_p1 = scmp.ne.s32.totalorder %s1658_s17, %s1302_s9  ;;  %s1306_s13 = sshll.u32 %s1376_s28, 4  ;;  %s1307_s13 = int_to_ptr.vmem [resolvable:$false] %s1306_s13 }
 0x451   : > { %s1308_s29 = scalar_lea.vmem %s1307_s13, 256  ;;  %p1309_p4 = scmp.lt.s32.totalorder %s1658_s17, %s1307_s13 }
 0x452   : > { %p1304_p2 = pnand %p1303_p1, %p1455_p5  ;;  %p1310_p7 = scmp.lt.s32.totalorder %s1308_s29, %s1302_s9 }
 0x454   : > { %p1305_p3 = pneg %p1304_p2  ;;  %p1311_p8 = por %p1310_p7, %p1309_p4 }
 0x456   : > { %p1312_p9 = pnand %p1311_p8, %p1305_p3 }
 0x4ca   : > { %v873_v20 = vpop.xlane.xlu1 %872 }
 0x4cb   : > { %1272 = vlog2.f32 %v873_v20 }
 0x4d5   : > { %v1273_v21 = vpop.eup %1272 }
 0x4d6   : > { %v875_v22 = vmul.f32 0.6931472, %v1273_v21 }
 0x4d8   : > { %v876_v23 = vsub.f32 %v869_v17, %v875_v22 }
 0x4da   : > { %877 = vst [vmem:[%s325_s19] sm:$0xff] %v876_v23 }
 0x4db   : > { %1315 = shalt.err (!%p1312_p9)
}
 0x4dc   : > { %s1316_s8 = scalar_lea.hbm %s1656_s22, 128  ;;  %s1320_s14 = scalar_lea.hbm %s1706_s7, 256 }
 0x4dd   : > { %p1317_p10 = scmp.ne.s32.totalorder %s1656_s22, %s1316_s8  ;;  %p1321_p13 = scmp.lt.u32.totalorder %s1656_s22, %s1706_s7 }
 0x4de   : > { %p1322_p0 = scmp.lt.u32.totalorder %s1320_s14, %s1316_s8  ;;  %p1324_p2 = scmp.lt.u32.totalorder %s1316_s8, %s1656_s22 }
 0x4df   : > { %p1318_p11 = pnand %p1317_p10, %p1455_p5 }
 0x4e0   : > { %p1323_p1 = por %p1322_p0, %p1321_p13 }
 0x4e1   : > { %p1319_p12 = pneg %p1318_p11 }
 0x4e2   : > { %p1325_p3 = por %p1324_p2, %p1323_p1 }
 0x4e4   : > { %p1326_p4 = pnand %p1325_p3, %p1319_p12 }
 0x4e6   : > { %1329 = shalt.err (!%p1326_p4)
}
 0x4e7   : > { %1163 = dma.vmem_to_hbm [thread:$0]  (%p1455_p5), %s1658_s17, 128, %s1656_s22, %s884_s21  }
 0x4e8 PF: > { %p1173_p7 = scmp.ge.s32.totalorder %s1368_s27, 2  ;;  %s925_s20 = sand.u32 1, %s1356_s24  }
 0x4e9   : > { %s926_s23 = scalar_lea.sflag [#allocation4], %s925_s20 }
 0x4ea   : > { %p1167_p8 = pnand %p1173_p7, %p1459_p6 }
 0x4ec   : > { %1347 = dma.done.wait (!%p1167_p8), %s926_s23, 256  }
 0x4ed   : > { %1349 = vsyncadd (!%p1167_p8), %s926_s23, 4294967040  ;;  %s935_s9 = scalar_lea.sflag [#allocation6], %s925_s20 }
 0x4ee   : > { %1351 = dma.done.wait (!%p1167_p8), %s935_s9, 128  }
 0x4ef   : > { %1353 = vsyncadd (!%p1167_p8), %s935_s9, 4294967168  ;;  %p21_p5 = scmp.ge.s32.totalorder %s1442_s30, 4   ;;  %s1709_s24 = smov %s1360_s25 }
 0x4f0   : > { %s1710_s25 = smov %s1364_s26  ;;  %s1711_s26 = smov %s1453_s10 }
 0x4f1   : > { %s1712_s27 = smov %s1442_s30  ;;  %23 = sbr.rel (!%p21_p5) target bundleno = 5 (0x5), region = 105 }
 0x4f8   :  { %940 = vsyncpa [#allocation4], 1 }
 0x4f9   :  { %942 = vsyncpa [#allocation4 + $0x1], 1 }
 0x4fa   :  { %943 = vsyncpa [#allocation6], 1 }
 0x4fb   :  { %945 = vsyncpa [#allocation6 + $0x1], 1 }

</bundles_post_ra>
